<compile_context>
chip_gen: v6e
topology: v6e:2x2x1
jax: 0.10.0
libtpu: 0.0.40
codegen_flags: <defaults>
</compile_context>

<pallas_src>
import jax
import jax.numpy as jnp
from jax.experimental import pallas as pl
from jax.experimental.pallas import tpu as pltpu


# ----------------------------------------------------------------------------
# Fused kernel: conv2+ReLU -> conv3+ReLU, conv4+ReLU, residual add.
#   x2_ref : (B*T, 96)   im2col patches of the input for conv2 (tap-major)
#   x4_ref : (B*T, 32)   stride-2 samples of the input for conv4 (k=1)
#   w2_ref : (96, 64)    b2_ref : (1, 64)
#   w3_ref : (3, 64, 64) per-tap conv3 weights   b3_ref : (1, 64)
#   w4_ref : (32, 64)    b4_ref : (1, 64)
#   o_ref  : (B*T, 64)
#   c2pad_ref : (B, T+2, 64) scratch — time-zero-padded conv2 output
#   x3buf_ref : (3, B*T, 64) scratch — conv3 im2col patches (tap-major)
# ----------------------------------------------------------------------------
def resblock_kernel(x2_ref, x4_ref, w2_ref, b2_ref, w3_ref, b3_ref,
                    w4_ref, b4_ref, o_ref, c2pad_ref, x3buf_ref):
    B, Tp2, C = c2pad_ref.shape          # static ints
    T = Tp2 - 2

    # conv2 + ReLU : single (B*T, 96) x (96, 64) MXU matmul.
    c2 = jnp.maximum(
        jnp.dot(x2_ref[...], w2_ref[...], preferred_element_type=jnp.float32)
        + b2_ref[...], 0.0)

    # Zero-padded (time) copy of the conv2 output for conv3 (k=3, padding=1).
    c2pad_ref[...] = jnp.zeros_like(c2pad_ref)
    for b in range(B):                                   # B is tiny & static
        c2pad_ref[b, 1:T + 1, :] = c2[b * T:(b + 1) * T, :]

    # Gather conv3 patches tap-major; every store is a dense 64-lane slab.
    for b in range(B):
        for j in range(3):
            x3buf_ref[j, b * T:(b + 1) * T, :] = c2pad_ref[b, j:j + T, :]

    # conv3 + ReLU : three (B*T, 64) x (64, 64) matmuls (one per tap).
    acc3 = (jnp.dot(x3buf_ref[0], w3_ref[0], preferred_element_type=jnp.float32)
            + jnp.dot(x3buf_ref[1], w3_ref[1], preferred_element_type=jnp.float32)
            + jnp.dot(x3buf_ref[2], w3_ref[2], preferred_element_type=jnp.float32)
            + b3_ref[...])
    c3 = jnp.maximum(acc3, 0.0)

    # conv4 + ReLU : single (B*T, 32) x (32, 64) matmul.
    c4 = jnp.maximum(
        jnp.dot(x4_ref[...], w4_ref[...], preferred_element_type=jnp.float32)
        + b4_ref[...], 0.0)

    # Residual add — one dense 64-lane store.
    o_ref[...] = c3 + c4


# ----------------------------------------------------------------------------
# Plain-JAX glue: parameter prep + im2col patch extraction + layout permutes.
# ----------------------------------------------------------------------------
def conv_as_mat(w):
    """(Cout, Cin, K) torch conv weight -> (K*Cin, Cout) matmul weight."""
    Cout, Cin, K = w.shape
    return jnp.transpose(w, (2, 1, 0)).reshape(K * Cin, Cout)


def init_params(key):
    p = {}

    def take(name, shape, scale=0.1):
        nonlocal key
        key, sub = jax.random.split(key)
        p[name] = scale * jax.random.normal(sub, shape, dtype=jnp.float32)

    take('conv2_w', (64, 32, 3)); take('conv2_b', (64,))
    take('conv3_w', (64, 64, 3)); take('conv3_b', (64,))
    take('conv4_w', (64, 32, 1)); take('conv4_b', (64,))
    return p


def prep_kernel_params(p):
    return {
        'w2': conv_as_mat(p['conv2_w']),                  # (96, 64)
        'b2': p['conv2_b'].reshape(1, 64),
        'w3': jnp.transpose(p['conv3_w'], (2, 1, 0)),     # (3, 64, 64) per-tap
        'b3': p['conv3_b'].reshape(1, 64),
        'w4': conv_as_mat(p['conv4_w']),                  # (32, 64)
        'b4': p['conv4_b'].reshape(1, 64),
    }


def residual_block_forward(x_ncl, kp):
    """x_ncl: (B, 32, L) like the PyTorch module.  Returns (B, 64, T)."""
    B, Cin, L = x_ncl.shape
    x = jnp.transpose(x_ncl, (0, 2, 1))                   # (B, L, 32) channels-last

    # conv2: k=3, stride=2, padding=2, dilation=2 -> output length T
    T = (L + 2 * 2 - 2 * (3 - 1) - 1) // 2 + 1
    xp = jnp.pad(x, ((0, 0), (2, 2), (0, 0)))
    taps = [xp[:, 2 * j:2 * j + 2 * T:2, :] for j in range(3)]   # 3 x (B, T, 32)
    x2 = jnp.concatenate(taps, axis=-1).reshape(B * T, 3 * Cin)  # tap-major im2col

    # conv4: k=1, stride=2 -> same output length T
    x4 = x[:, 0:2 * T:2, :].reshape(B * T, Cin)

    out2d = pl.pallas_call(
        resblock_kernel,
        out_shape=jax.ShapeDtypeStruct((B * T, 64), jnp.float32),
        in_specs=[pl.BlockSpec(memory_space=pltpu.MemorySpace.VMEM)] * 8,
        out_specs=pl.BlockSpec(memory_space=pltpu.MemorySpace.VMEM),
        scratch_shapes=[
            pltpu.VMEM((B, T + 2, 64), jnp.float32),   # time-padded conv2 output
            pltpu.VMEM((3, B * T, 64), jnp.float32),   # conv3 im2col buffer
        ],
    )(x2, x4, kp['w2'], kp['b2'], kp['w3'], kp['b3'], kp['w4'], kp['b4'])

    return jnp.transpose(out2d.reshape(B, T, 64), (0, 2, 1))   # back to NCL


# ----------------------------------------------------------------------------
# Pure-JAX reference (independent code path) for correctness checking.
# ----------------------------------------------------------------------------
def ref_forward(x, p):
    relu = lambda v: jnp.maximum(v, 0.0)

    def conv1d(x, w, b, stride, padding, dilation=1):
        out = jax.lax.conv_general_dilated(
            x, w, window_strides=(stride,), padding=[(padding, padding)],
            rhs_dilation=(dilation,), dimension_numbers=('NCH', 'OIH', 'NCH'))
        return out + b[None, :, None]

    c2 = relu(conv1d(x, p['conv2_w'], p['conv2_b'], 2, 2, 2))
    c3 = relu(conv1d(c2, p['conv3_w'], p['conv3_b'], 1, 1))
    c4 = relu(conv1d(x, p['conv4_w'], p['conv4_b'], 2, 0))
    return c3 + c4


if __name__ == "__main__":
    key = jax.random.PRNGKey(0)
    pkey, xkey = jax.random.split(key)
    params = init_params(pkey)
    kparams = prep_kernel_params(params)

    # (B=2, Cin=32, L=16) -> residual-block output (2, 64, 8)
    x = jax.random.normal(xkey, (2, 32, 16), dtype=jnp.float32)

    out = jax.jit(residual_block_forward)(x, kparams)
    out = jax.block_until_ready(out)

    ref = jax.jit(ref_forward)(x, params)
    ref = jax.block_until_ready(ref)

    assert out.shape == ref.shape == (2, 64, 8), (out.shape, ref.shape)
    max_err = float(jnp.max(jnp.abs(out - ref)))
    assert max_err < 1e-3, f"max abs err {max_err}"
    print("KERNEL_OK")
</pallas_src>

<mosaic_0001>
module attributes {stable_mosaic.version = 11 : i64} {
  func.func @resblock_kernel(%arg0: memref<16x96xf32, #tpu.memory_space<vmem>>, %arg1: memref<16x32xf32, #tpu.memory_space<vmem>>, %arg2: memref<96x64xf32, #tpu.memory_space<vmem>>, %arg3: memref<1x64xf32, #tpu.memory_space<vmem>>, %arg4: memref<3x64x64xf32, #tpu.memory_space<vmem>>, %arg5: memref<1x64xf32, #tpu.memory_space<vmem>>, %arg6: memref<32x64xf32, #tpu.memory_space<vmem>>, %arg7: memref<1x64xf32, #tpu.memory_space<vmem>>, %arg8: memref<16x64xf32, #tpu.memory_space<vmem>>, %arg9: memref<2x10x64xf32, #tpu.memory_space<vmem>>, %arg10: memref<3x16x64xf32, #tpu.memory_space<vmem>>) attributes {dimension_semantics = [], scalar_prefetch = 0 : i64, scratch_operands = 2 : i64, tpu.core_type = #tpu.core_type<tc>} {
    %c0 = arith.constant 0 : index
    %c0_0 = arith.constant 0 : index
    %0 = vector.load %arg0[%c0, %c0_0] : memref<16x96xf32, #tpu.memory_space<vmem>>, vector<16x96xf32>
    %c0_1 = arith.constant 0 : index
    %c0_2 = arith.constant 0 : index
    %1 = vector.load %arg2[%c0_1, %c0_2] : memref<96x64xf32, #tpu.memory_space<vmem>>, vector<96x64xf32>
    %cst = arith.constant dense<0.000000e+00> : vector<16x64xf32>
    %2 = tpu.matmul %0, %1, %cst {dimension_numbers = #tpu.dot_dimension_numbers<[1], [0], [0], [1], [0, 0, 1, 1], [], []>} : vector<16x96xf32>, vector<96x64xf32>, vector<16x64xf32> -> vector<16x64xf32>
    %c0_3 = arith.constant 0 : index
    %c0_4 = arith.constant 0 : index
    %3 = vector.load %arg3[%c0_3, %c0_4] : memref<1x64xf32, #tpu.memory_space<vmem>>, vector<1x64xf32>
    %4 = vector.broadcast %3 : vector<1x64xf32> to vector<16x64xf32>
    %5 = arith.addf %2, %4 : vector<16x64xf32>
    %cst_5 = arith.constant 0.000000e+00 : f32
    %6 = vector.broadcast %cst_5 : f32 to vector<16x64xf32>
    %7 = arith.maximumf %5, %6 : vector<16x64xf32>
    %cst_6 = arith.constant 0.000000e+00 : f32
    %8 = vector.broadcast %cst_6 : f32 to vector<2x10x64xf32>
    %c0_7 = arith.constant 0 : index
    %c0_8 = arith.constant 0 : index
    %c0_9 = arith.constant 0 : index
    %9 = vector.load %arg9[%c0_7, %c0_8, %c0_9] : memref<2x10x64xf32, #tpu.memory_space<vmem>>, vector<2x10x64xf32>
    tpu.vector_store %arg9[%c0_7, %c0_8, %c0_9], %8 {strides = array<i32>} : memref<2x10x64xf32, #tpu.memory_space<vmem>>, vector<2x10x64xf32>,
    %10 = vector.extract_strided_slice %7 {offsets = [0, 0], sizes = [8, 64], strides = [1, 1]} : vector<16x64xf32> to vector<8x64xf32>
    %c0_10 = arith.constant 0 : index
    %c1 = arith.constant 1 : index
    %c0_11 = arith.constant 0 : index
    %11 = vector.load %arg9[%c0_10, %c1, %c0_11] : memref<2x10x64xf32, #tpu.memory_space<vmem>>, vector<1x8x64xf32>
    %12 = vector.shape_cast %11 : vector<1x8x64xf32> to vector<8x64xf32>
    %13 = vector.shape_cast %10 : vector<8x64xf32> to vector<1x8x64xf32>
    tpu.vector_store %arg9[%c0_10, %c1, %c0_11], %13 {strides = array<i32>} : memref<2x10x64xf32, #tpu.memory_space<vmem>>, vector<1x8x64xf32>,
    %14 = vector.extract_strided_slice %7 {offsets = [8, 0], sizes = [8, 64], strides = [1, 1]} : vector<16x64xf32> to vector<8x64xf32>
    %c1_12 = arith.constant 1 : index
    %c1_13 = arith.constant 1 : index
    %c0_14 = arith.constant 0 : index
    %15 = vector.load %arg9[%c1_12, %c1_13, %c0_14] : memref<2x10x64xf32, #tpu.memory_space<vmem>>, vector<1x8x64xf32>
    %16 = vector.shape_cast %15 : vector<1x8x64xf32> to vector<8x64xf32>
    %17 = vector.shape_cast %14 : vector<8x64xf32> to vector<1x8x64xf32>
    tpu.vector_store %arg9[%c1_12, %c1_13, %c0_14], %17 {strides = array<i32>} : memref<2x10x64xf32, #tpu.memory_space<vmem>>, vector<1x8x64xf32>,
    %c0_15 = arith.constant 0 : index
    %c0_16 = arith.constant 0 : index
    %c0_17 = arith.constant 0 : index
    %18 = vector.load %arg9[%c0_15, %c0_16, %c0_17] : memref<2x10x64xf32, #tpu.memory_space<vmem>>, vector<1x8x64xf32>
    %19 = vector.shape_cast %18 : vector<1x8x64xf32> to vector<8x64xf32>
    %c0_18 = arith.constant 0 : index
    %c0_19 = arith.constant 0 : index
    %c0_20 = arith.constant 0 : index
    %20 = vector.load %arg10[%c0_18, %c0_19, %c0_20] : memref<3x16x64xf32, #tpu.memory_space<vmem>>, vector<1x8x64xf32>
    %21 = vector.shape_cast %20 : vector<1x8x64xf32> to vector<8x64xf32>
    %22 = vector.shape_cast %19 : vector<8x64xf32> to vector<1x8x64xf32>
    tpu.vector_store %arg10[%c0_18, %c0_19, %c0_20], %22 {strides = array<i32>} : memref<3x16x64xf32, #tpu.memory_space<vmem>>, vector<1x8x64xf32>,
    %c0_21 = arith.constant 0 : index
    %c1_22 = arith.constant 1 : index
    %c0_23 = arith.constant 0 : index
    %23 = vector.load %arg9[%c0_21, %c1_22, %c0_23] : memref<2x10x64xf32, #tpu.memory_space<vmem>>, vector<1x8x64xf32>
    %24 = vector.shape_cast %23 : vector<1x8x64xf32> to vector<8x64xf32>
    %c1_24 = arith.constant 1 : index
    %c0_25 = arith.constant 0 : index
    %c0_26 = arith.constant 0 : index
    %25 = vector.load %arg10[%c1_24, %c0_25, %c0_26] : memref<3x16x64xf32, #tpu.memory_space<vmem>>, vector<1x8x64xf32>
    %26 = vector.shape_cast %25 : vector<1x8x64xf32> to vector<8x64xf32>
    %27 = vector.shape_cast %24 : vector<8x64xf32> to vector<1x8x64xf32>
    tpu.vector_store %arg10[%c1_24, %c0_25, %c0_26], %27 {strides = array<i32>} : memref<3x16x64xf32, #tpu.memory_space<vmem>>, vector<1x8x64xf32>,
    %c0_27 = arith.constant 0 : index
    %c2 = arith.constant 2 : index
    %c0_28 = arith.constant 0 : index
    %28 = vector.load %arg9[%c0_27, %c2, %c0_28] : memref<2x10x64xf32, #tpu.memory_space<vmem>>, vector<1x8x64xf32>
    %29 = vector.shape_cast %28 : vector<1x8x64xf32> to vector<8x64xf32>
    %c2_29 = arith.constant 2 : index
    %c0_30 = arith.constant 0 : index
    %c0_31 = arith.constant 0 : index
    %30 = vector.load %arg10[%c2_29, %c0_30, %c0_31] : memref<3x16x64xf32, #tpu.memory_space<vmem>>, vector<1x8x64xf32>
    %31 = vector.shape_cast %30 : vector<1x8x64xf32> to vector<8x64xf32>
    %32 = vector.shape_cast %29 : vector<8x64xf32> to vector<1x8x64xf32>
    tpu.vector_store %arg10[%c2_29, %c0_30, %c0_31], %32 {strides = array<i32>} : memref<3x16x64xf32, #tpu.memory_space<vmem>>, vector<1x8x64xf32>,
    %c1_32 = arith.constant 1 : index
    %c0_33 = arith.constant 0 : index
    %c0_34 = arith.constant 0 : index
    %33 = vector.load %arg9[%c1_32, %c0_33, %c0_34] : memref<2x10x64xf32, #tpu.memory_space<vmem>>, vector<1x8x64xf32>
    %34 = vector.shape_cast %33 : vector<1x8x64xf32> to vector<8x64xf32>
    %c0_35 = arith.constant 0 : index
    %c8 = arith.constant 8 : index
    %c0_36 = arith.constant 0 : index
    %35 = vector.load %arg10[%c0_35, %c8, %c0_36] : memref<3x16x64xf32, #tpu.memory_space<vmem>>, vector<1x8x64xf32>
    %36 = vector.shape_cast %35 : vector<1x8x64xf32> to vector<8x64xf32>
    %37 = vector.shape_cast %34 : vector<8x64xf32> to vector<1x8x64xf32>
    tpu.vector_store %arg10[%c0_35, %c8, %c0_36], %37 {strides = array<i32>} : memref<3x16x64xf32, #tpu.memory_space<vmem>>, vector<1x8x64xf32>,
    %c1_37 = arith.constant 1 : index
    %c1_38 = arith.constant 1 : index
    %c0_39 = arith.constant 0 : index
    %38 = vector.load %arg9[%c1_37, %c1_38, %c0_39] : memref<2x10x64xf32, #tpu.memory_space<vmem>>, vector<1x8x64xf32>
    %39 = vector.shape_cast %38 : vector<1x8x64xf32> to vector<8x64xf32>
    %c1_40 = arith.constant 1 : index
    %c8_41 = arith.constant 8 : index
    %c0_42 = arith.constant 0 : index
    %40 = vector.load %arg10[%c1_40, %c8_41, %c0_42] : memref<3x16x64xf32, #tpu.memory_space<vmem>>, vector<1x8x64xf32>
    %41 = vector.shape_cast %40 : vector<1x8x64xf32> to vector<8x64xf32>
    %42 = vector.shape_cast %39 : vector<8x64xf32> to vector<1x8x64xf32>
    tpu.vector_store %arg10[%c1_40, %c8_41, %c0_42], %42 {strides = array<i32>} : memref<3x16x64xf32, #tpu.memory_space<vmem>>, vector<1x8x64xf32>,
    %c1_43 = arith.constant 1 : index
    %c2_44 = arith.constant 2 : index
    %c0_45 = arith.constant 0 : index
    %43 = vector.load %arg9[%c1_43, %c2_44, %c0_45] : memref<2x10x64xf32, #tpu.memory_space<vmem>>, vector<1x8x64xf32>
    %44 = vector.shape_cast %43 : vector<1x8x64xf32> to vector<8x64xf32>
    %c2_46 = arith.constant 2 : index
    %c8_47 = arith.constant 8 : index
    %c0_48 = arith.constant 0 : index
    %45 = vector.load %arg10[%c2_46, %c8_47, %c0_48] : memref<3x16x64xf32, #tpu.memory_space<vmem>>, vector<1x8x64xf32>
    %46 = vector.shape_cast %45 : vector<1x8x64xf32> to vector<8x64xf32>
    %47 = vector.shape_cast %44 : vector<8x64xf32> to vector<1x8x64xf32>
    tpu.vector_store %arg10[%c2_46, %c8_47, %c0_48], %47 {strides = array<i32>} : memref<3x16x64xf32, #tpu.memory_space<vmem>>, vector<1x8x64xf32>,
    %c0_49 = arith.constant 0 : index
    %c0_50 = arith.constant 0 : index
    %c0_51 = arith.constant 0 : index
    %48 = vector.load %arg10[%c0_49, %c0_50, %c0_51] : memref<3x16x64xf32, #tpu.memory_space<vmem>>, vector<1x16x64xf32>
    %49 = vector.shape_cast %48 : vector<1x16x64xf32> to vector<16x64xf32>
    %c0_52 = arith.constant 0 : index
    %c0_53 = arith.constant 0 : index
    %c0_54 = arith.constant 0 : index
    %50 = vector.load %arg4[%c0_52, %c0_53, %c0_54] : memref<3x64x64xf32, #tpu.memory_space<vmem>>, vector<1x64x64xf32>
    %51 = vector.shape_cast %50 : vector<1x64x64xf32> to vector<64x64xf32>
    %cst_55 = arith.constant dense<0.000000e+00> : vector<16x64xf32>
    %52 = tpu.matmul %49, %51, %cst_55 {dimension_numbers = #tpu.dot_dimension_numbers<[1], [0], [0], [1], [0, 0, 1, 1], [], []>} : vector<16x64xf32>, vector<64x64xf32>, vector<16x64xf32> -> vector<16x64xf32>
    %c1_56 = arith.constant 1 : index
    %c0_57 = arith.constant 0 : index
    %c0_58 = arith.constant 0 : index
    %53 = vector.load %arg10[%c1_56, %c0_57, %c0_58] : memref<3x16x64xf32, #tpu.memory_space<vmem>>, vector<1x16x64xf32>
    %54 = vector.shape_cast %53 : vector<1x16x64xf32> to vector<16x64xf32>
    %c1_59 = arith.constant 1 : index
    %c0_60 = arith.constant 0 : index
    %c0_61 = arith.constant 0 : index
    %55 = vector.load %arg4[%c1_59, %c0_60, %c0_61] : memref<3x64x64xf32, #tpu.memory_space<vmem>>, vector<1x64x64xf32>
    %56 = vector.shape_cast %55 : vector<1x64x64xf32> to vector<64x64xf32>
    %cst_62 = arith.constant dense<0.000000e+00> : vector<16x64xf32>
    %57 = tpu.matmul %54, %56, %cst_62 {dimension_numbers = #tpu.dot_dimension_numbers<[1], [0], [0], [1], [0, 0, 1, 1], [], []>} : vector<16x64xf32>, vector<64x64xf32>, vector<16x64xf32> -> vector<16x64xf32>
    %58 = arith.addf %52, %57 : vector<16x64xf32>
    %c2_63 = arith.constant 2 : index
    %c0_64 = arith.constant 0 : index
    %c0_65 = arith.constant 0 : index
    %59 = vector.load %arg10[%c2_63, %c0_64, %c0_65] : memref<3x16x64xf32, #tpu.memory_space<vmem>>, vector<1x16x64xf32>
    %60 = vector.shape_cast %59 : vector<1x16x64xf32> to vector<16x64xf32>
    %c2_66 = arith.constant 2 : index
    %c0_67 = arith.constant 0 : index
    %c0_68 = arith.constant 0 : index
    %61 = vector.load %arg4[%c2_66, %c0_67, %c0_68] : memref<3x64x64xf32, #tpu.memory_space<vmem>>, vector<1x64x64xf32>
    %62 = vector.shape_cast %61 : vector<1x64x64xf32> to vector<64x64xf32>
    %cst_69 = arith.constant dense<0.000000e+00> : vector<16x64xf32>
    %63 = tpu.matmul %60, %62, %cst_69 {dimension_numbers = #tpu.dot_dimension_numbers<[1], [0], [0], [1], [0, 0, 1, 1], [], []>} : vector<16x64xf32>, vector<64x64xf32>, vector<16x64xf32> -> vector<16x64xf32>
    %64 = arith.addf %58, %63 : vector<16x64xf32>
    %c0_70 = arith.constant 0 : index
    %c0_71 = arith.constant 0 : index
    %65 = vector.load %arg5[%c0_70, %c0_71] : memref<1x64xf32, #tpu.memory_space<vmem>>, vector<1x64xf32>
    %66 = vector.broadcast %65 : vector<1x64xf32> to vector<16x64xf32>
    %67 = arith.addf %64, %66 : vector<16x64xf32>
    %cst_72 = arith.constant 0.000000e+00 : f32
    %68 = vector.broadcast %cst_72 : f32 to vector<16x64xf32>
    %69 = arith.maximumf %67, %68 : vector<16x64xf32>
    %c0_73 = arith.constant 0 : index
    %c0_74 = arith.constant 0 : index
    %70 = vector.load %arg1[%c0_73, %c0_74] : memref<16x32xf32, #tpu.memory_space<vmem>>, vector<16x32xf32>
    %c0_75 = arith.constant 0 : index
    %c0_76 = arith.constant 0 : index
    %71 = vector.load %arg6[%c0_75, %c0_76] : memref<32x64xf32, #tpu.memory_space<vmem>>, vector<32x64xf32>
    %cst_77 = arith.constant dense<0.000000e+00> : vector<16x64xf32>
    %72 = tpu.matmul %70, %71, %cst_77 {dimension_numbers = #tpu.dot_dimension_numbers<[1], [0], [0], [1], [0, 0, 1, 1], [], []>} : vector<16x32xf32>, vector<32x64xf32>, vector<16x64xf32> -> vector<16x64xf32>
    %c0_78 = arith.constant 0 : index
    %c0_79 = arith.constant 0 : index
    %73 = vector.load %arg7[%c0_78, %c0_79] : memref<1x64xf32, #tpu.memory_space<vmem>>, vector<1x64xf32>
    %74 = vector.broadcast %73 : vector<1x64xf32> to vector<16x64xf32>
    %75 = arith.addf %72, %74 : vector<16x64xf32>
    %cst_80 = arith.constant 0.000000e+00 : f32
    %76 = vector.broadcast %cst_80 : f32 to vector<16x64xf32>
    %77 = arith.maximumf %75, %76 : vector<16x64xf32>
    %78 = arith.addf %69, %77 : vector<16x64xf32>
    %c0_81 = arith.constant 0 : index
    %c0_82 = arith.constant 0 : index
    %79 = vector.load %arg8[%c0_81, %c0_82] : memref<16x64xf32, #tpu.memory_space<vmem>>, vector<16x64xf32>
    tpu.vector_store %arg8[%c0_81, %c0_82], %78 {strides = array<i32>} : memref<16x64xf32, #tpu.memory_space<vmem>>, vector<16x64xf32>,
    return
  }
}

</mosaic_0001>

<bundles_post_ra>
// kernel: residual_block_forward.1
= control target key start
LH: loop header
LB: loop body
LE: loop exit
PB: predicated region body
PF: predicated region fallthrough
CT: control target
= control target key end

     0   :  { %vm51_vm0 = vcmask 785408   ;;  %s978_s0 = inlined_call_operand.vmem [shape: f32[16,96], index: 0, kind: input, shape index: {}]   ;;  %s979_s1 = inlined_call_operand.vmem [shape: f32[16,32], index: 1, kind: input, shape index: {}]   ;;  %s980_s2 = inlined_call_operand.vmem [shape: f32[96,64], index: 2, kind: input, shape index: {}]   ;;  %s981_s3 = inlined_call_operand.vmem [shape: f32[1,64], index: 3, kind: input, shape index: {}]   ;;  %s982_s4 = inlined_call_operand.vmem [shape: f32[3,64,64], index: 4, kind: input, shape index: {}]   ;;  %s983_s5 = inlined_call_operand.vmem [shape: f32[1,64], index: 5, kind: input, shape index: {}]   ;;  %s984_s6 = inlined_call_operand.vmem [shape: f32[32,64], index: 6, kind: input, shape index: {}]   ;;  %s985_s7 = inlined_call_operand.vmem [shape: f32[1,64], index: 7, kind: input, shape index: {}]   ;;  %s986_s8 = inlined_call_operand.hbm [shape: f32[16,64], index: 8, kind: output, shape index: {}]  }
   0x1   :  { %v43_v0 = vld [vmem:[%s980_s2 + $0x58] sm:$0xff]  ;;  %v42_v1 = vld [vmem:[%s980_s2 + $0x50] sm:$0xff]  ;;  %v41_v2 = vld [vmem:[%s980_s2 + $0x48] sm:$0xff] }
   0x2   :  { %642 = vmatprep.subr.mxu0 %v43_v0  ;;  %v40_v3 = vld [vmem:[%s980_s2 + $0x40] sm:$0xff] }
   0x3   :  { %643 = vmatpush3.msra.mxu0 %v43_v0  ;;  %v30_v4 = vld [vmem:[%s978_s0] sm:$0xff] }
   0x4   :  { %644 = vmatprep.subr.mxu0 %v42_v1 }
   0x5   :  { %645 = vmatpush3.msra.mxu0 %v42_v1 }
   0x6   :  { %13 = vsyncpa [#allocation5], 0  ;;  %646 = vmatprep.subr.mxu0 %v41_v2  ;;  %666 = vmatprep.mubr.msk.f32.mxu0 %vm51_vm0, %v30_v4  ;;  %v39_v5 = vld [vmem:[%s980_s2 + $0x38] sm:$0xff]  ;;  %v38_v6 = vld [vmem:[%s980_s2 + $0x30] sm:$0xff]  ;;  %vm135_vm1 = vcmask 523264   ;;  %vm137_vm2 = vcmask 517120  }
   0x7   :  { %647 = vmatpush3.msra.mxu0 %v41_v2  ;;  %v37_v7 = vld [vmem:[%s980_s2 + $0x28] sm:$0xff]  ;;  %v36_v8 = vld [vmem:[%s980_s2 + $0x20] sm:$0xff]  ;;  %v35_v9 = vld [vmem:[%s980_s2 + $0x18] sm:$0xff]  ;;  %v763_v14 = vmov 0.0   ;;  %vm459_vm3 = vcmask 261120   ;;  %s764_s22 = smov [#allocation4]  }
   0x8   :  { %648 = vmatprep.subr.mxu0 %v40_v3  ;;  %v34_v10 = vld [vmem:[%s980_s2 + $0x10] sm:$0xff]  ;;  %v33_v11 = vld [vmem:[%s980_s2 + $0x8] sm:$0xff]  ;;  %v32_v12 = vld [vmem:[%s980_s2] sm:$0xff]  ;;  %139 = vst.msk [vmem:[#allocation2 + $0x10] sm:$0xff] %vm135_vm1, %v763_v14  ;;  %s552_s23 = sshll.u32 %s764_s22, 4  ;;  %s553_s23 = int_to_ptr.vmem [resolvable:$true] %s552_s23 }
   0x9   :  { %649 = vmatpush3.msra.mxu0 %v40_v3  ;;  %v31_v13 = vld [vmem:[%s978_s0 + $0x8] sm:$0xff]  ;;  %140 = vst.msk [vmem:[#allocation2 + $0x18] sm:$0x3] %vm137_vm2, %v763_v14  ;;  %138 = vst.msk [vmem:[#allocation2 + $0x8] sm:$0x3] %vm137_vm2, %v763_v14  ;;  %v573_v15 = vld [vmem:[%s982_s4 + $0x78] sm:$0xff]  ;;  %p746_p1 = scmp.lt.s32.totalorder %s553_s23, %s553_s23 }
   0xa   :  { %650 = vmatprep.subr.mxu0 %v39_v5  ;;  %136 = vst.msk [vmem:[#allocation2] sm:$0xff] %vm135_vm1, %v763_v14  ;;  %669 = vmatprep.subr.mxu1 %v573_v15  ;;  %v585_v16 = vld [vmem:[%s982_s4 + $0xb8] sm:$0xff]  ;;  %v572_v17 = vld [vmem:[%s982_s4 + $0x70] sm:$0xff]  ;;  %v571_v19 = vld [vmem:[%s982_s4 + $0x68] sm:$0xff] }
   0xb   :  { %651 = vmatpush3.msra.mxu0 %v39_v5  ;;  %v584_v18 = vld [vmem:[%s982_s4 + $0xb0] sm:$0xff]  ;;  %670 = vmatpush3.msra.mxu1 %v573_v15  ;;  %v583_v20 = vld [vmem:[%s982_s4 + $0xa8] sm:$0xff]  ;;  %v570_v21 = vld [vmem:[%s982_s4 + $0x60] sm:$0xff] }
   0xc   :  { %652 = vmatprep.subr.mxu0 %v38_v6  ;;  %671 = vmatprep.subr.mxu1 %v572_v17  ;;  %v582_v22 = vld [vmem:[%s982_s4 + $0xa0] sm:$0xff]  ;;  %v569_v23 = vld [vmem:[%s982_s4 + $0x58] sm:$0xff]  ;;  %v568_v25 = vld [vmem:[%s982_s4 + $0x50] sm:$0xff] }
   0xd   :  { %653 = vmatpush3.msra.mxu0 %v38_v6  ;;  %672 = vmatpush3.msra.mxu1 %v572_v17  ;;  %v581_v24 = vld [vmem:[%s982_s4 + $0x98] sm:$0xff]  ;;  %v580_v26 = vld [vmem:[%s982_s4 + $0x90] sm:$0xff]  ;;  %v567_v27 = vld [vmem:[%s982_s4 + $0x48] sm:$0xff] }
   0xe   :  { %654 = vmatprep.subr.mxu0 %v37_v7  ;;  %673 = vmatprep.subr.mxu1 %v571_v19  ;;  %v579_v28 = vld [vmem:[%s982_s4 + $0x88] sm:$0xff]  ;;  %v566_v29 = vld [vmem:[%s982_s4 + $0x40] sm:$0xff]  ;;  %v167_v31 = vld [vmem:[%s982_s4 + $0x38] sm:$0xff] }
   0xf   :  { %655 = vmatpush3.msra.mxu0 %v37_v7  ;;  %674 = vmatpush3.msra.mxu1 %v571_v19  ;;  %v578_v30 = vld [vmem:[%s982_s4 + $0x80] sm:$0xff]  ;;  %v166_v49 = vld [vmem:[%s982_s4 + $0x30] sm:$0xff]  ;;  %v165_v51 = vld [vmem:[%s982_s4 + $0x28] sm:$0xff] }
  0x10   :  { %656 = vmatprep.subr.mxu0 %v36_v8  ;;  %675 = vmatprep.subr.mxu1 %v570_v21  ;;  %v563_v32 = vld [vmem:[%s981_s3] ss:$0 sm:$0xff]  ;;  %v163_v53 = vld [vmem:[%s982_s4 + $0x18] sm:$0xff]  ;;  %v162_v54 = vld [vmem:[%s982_s4 + $0x10] sm:$0xff] }
  0x11   :  { %657 = vmatpush3.msra.mxu0 %v36_v8  ;;  %676 = vmatpush3.msra.mxu1 %v570_v21  ;;  %v164_v52 = vld [vmem:[%s982_s4 + $0x20] sm:$0xff]  ;;  %v161_v55 = vld [vmem:[%s982_s4 + $0x8] sm:$0xff]  ;;  %v451_v57 = vld [vmem:[%s984_s6 + $0x18] sm:$0xff] }
  0x12   :  { %658 = vmatprep.subr.mxu0 %v35_v9  ;;  %677 = vmatprep.subr.mxu1 %v569_v23  ;;  %v160_v56 = vld [vmem:[%s982_s4] sm:$0xff]  ;;  %v450_v60 = vld [vmem:[%s984_s6 + $0x10] sm:$0xff]  ;;  %v449_v61 = vld [vmem:[%s984_s6 + $0x8] sm:$0xff] }
  0x13   :  { %659 = vmatpush3.msra.mxu0 %v35_v9  ;;  %678 = vmatpush3.msra.mxu1 %v569_v23  ;;  %v446_v58 = vld [vmem:[%s979_s1] sm:$0xff]  ;;  %v447_v63 = vld [vmem:[%s979_s1 + $0x8] sm:$0xff] }
  0x14   :  { %660 = vmatprep.subr.mxu0 %v34_v10  ;;  %679 = vmatprep.subr.mxu1 %v568_v25  ;;  %v448_v62 = vld [vmem:[%s984_s6] sm:$0xff] }
  0x15   :  { %661 = vmatpush3.msra.mxu0 %v34_v10  ;;  %680 = vmatpush3.msra.mxu1 %v568_v25  ;;  %v588_v9 = vld [vmem:[%s983_s5] ss:$0 sm:$0xff]  ;;  %s741_s5 = scalar_lea.vmem %s553_s23, 256 }
  0x16   :  { %662 = vmatprep.subr.mxu0 %v33_v11  ;;  %681 = vmatprep.subr.mxu1 %v567_v27  ;;  %p742_p0 = scmp.ne.s32.totalorder %s553_s23, %s741_s5  ;;  %p747_p2 = scmp.lt.s32.totalorder %s741_s5, %s741_s5 }
  0x17   :  { %663 = vmatpush3.msra.mxu0 %v33_v11  ;;  %682 = vmatpush3.msra.mxu1 %v567_v27  ;;  %v589_v11 = vld [vmem:[%s985_s7] ss:$0 sm:$0xff] }
  0x18   :  { %664 = vmatprep.subr.mxu0 %v32_v12  ;;  %683 = vmatprep.subr.mxu1 %v566_v29  ;;  %p748_p3 = por %p747_p2, %p746_p1 }
  0x19   :  { %665 = vmatpush3.msra.mxu0 %v32_v12  ;;  %684 = vmatpush3.msra.mxu1 %v566_v29 }
  0x1a   :  { %667 = vmatmul.mubr.msk.f32.vlgmr.msra.gmra.mxu0 %vm51_vm0, %v31_v13  ;;  %707 = vmatprep.subr.mxu0 %v585_v16  ;;  %p749_p4 = pnand %p748_p3, %p742_p0 }
  0x1b   :  { %708 = vmatpush3.msra.mxu0 %v585_v16  ;;  %688 = vmatprep.subr.mxu1 %v167_v31 }
  0x1c   :  { %709 = vmatprep.subr.mxu0 %v584_v18 }
  0x1d   :  { %710 = vmatpush3.msra.mxu0 %v584_v18 }
  0x1e   :  { %711 = vmatprep.subr.mxu0 %v583_v20 }
  0x1f   :  { %712 = vmatpush3.msra.mxu0 %v583_v20 }
  0x20   :  { %713 = vmatprep.subr.mxu0 %v582_v22 }
  0x21   :  { %714 = vmatpush3.msra.mxu0 %v582_v22 }
  0x22   :  { %715 = vmatprep.subr.mxu0 %v581_v24 }
  0x23   :  { %716 = vmatpush3.msra.mxu0 %v581_v24 }
  0x24   :  { %717 = vmatprep.subr.mxu0 %v580_v26 }
  0x25   :  { %718 = vmatpush3.msra.mxu0 %v580_v26 }
  0x26   :  { %719 = vmatprep.subr.mxu0 %v579_v28 }
  0x27   :  { %720 = vmatpush3.msra.mxu0 %v579_v28 }
  0x28   :  { %721 = vmatprep.subr.mxu0 %v578_v30 }
  0x29   :  { %722 = vmatpush3.msra.mxu0 %v578_v30 }
  0xda   :  { %v668_v33 = vpop.f32.mrf.mxu0 }
  0xdb   :  { %v130_v34 = vadd.f32 %v668_v33, %v563_v32 }
  0xdc   :  { %v124_v35 = vpop.f32.mrf.mxu0 }
  0xdd   :  { %v134_v36 = vmax.f32 %v130_v34, 0.0  ;;  %v125_v37 = vadd.f32 %v563_v32, %v124_v35 }
  0xdf   :  { %143 = vst.msk [vmem:[#allocation2 + $0x11] sm:$0xff] %vm135_vm1, %v134_v36  ;;  %v133_v38 = vmax.f32 %v125_v37, 0.0 }
  0xe1   :  { %141 = vst.msk [vmem:[#allocation2 + $0x1] sm:$0xff] %vm135_vm1, %v133_v38 }
  0xe6   :  { %v154_v39 = vld [vmem:[#allocation2 + $0x11] sm:$0xff] }
  0xe7   :  { %v156_v40 = vld [vmem:[#allocation2 + $0x12] sm:$0xff]  ;;  %155 = vst.msk [vmem:[#allocation3 + $0x18] sm:$0xff] %vm135_vm1, %v154_v39 }
  0xe8   :  { %v152_v41 = vld [vmem:[#allocation2 + $0x10] sm:$0xff]  ;;  %157 = vst.msk [vmem:[#allocation3 + $0x28] sm:$0xff] %vm135_vm1, %v156_v40  ;;  %v146_v42 = vld [vmem:[#allocation2 + $0x1] sm:$0xff] }
  0xe9   :  { %153 = vst.msk [vmem:[#allocation3 + $0x8] sm:$0xff] %vm135_vm1, %v152_v41  ;;  %v149_v43 = vld [vmem:[#allocation2 + $0x2] sm:$0xff]  ;;  %148 = vst.msk [vmem:[#allocation3 + $0x10] sm:$0xff] %vm135_vm1, %v146_v42 }
  0xea   :  { %v144_v44 = vld [vmem:[#allocation2] sm:$0xff]  ;;  %151 = vst.msk [vmem:[#allocation3 + $0x20] sm:$0xff] %vm135_vm1, %v149_v43 }
  0xeb   :  { %145 = vst.msk [vmem:[#allocation3] sm:$0xff] %vm135_vm1, %v144_v44 }
  0xee   :  { %v169_v47 = vld [vmem:[#allocation3 + $0x18] sm:$0xff] }
  0xef   :  { %v342_v48 = vld [vmem:[#allocation3 + $0x28] sm:$0xff] }
  0xf0   :  { %v168_v45 = vld [vmem:[#allocation3 + $0x10] sm:$0xff]  ;;  %v159_v59 = vld [vmem:[#allocation3 + $0x8] sm:$0xff] }
  0xf1   :  { %v341_v46 = vld [vmem:[#allocation3 + $0x20] sm:$0xff]  ;;  %685 = vmatprep.mubr.msk.f32.mxu1 %vm135_vm1, %v168_v45 }
  0xf2   :  { %723 = vmatprep.mubr.msk.f32.mxu0 %vm135_vm1, %v341_v46  ;;  %686 = vmatmul.mubr.msk.f32.vlgmr.msra.gmra.mxu1 %vm135_vm1, %v169_v47  ;;  %v158_v50 = vld [vmem:[#allocation3] sm:$0xff] }
  0xf3   :  { %724 = vmatmul.mubr.msk.f32.vlgmr.msra.gmra.mxu0 %vm135_vm1, %v342_v48  ;;  %689 = vmatpush3.msra.mxu1 %v167_v31 }
  0xf4   :  { %704 = vmatprep.mubr.msk.f32.mxu1 %vm135_vm1, %v158_v50  ;;  %690 = vmatprep.subr.mxu1 %v166_v49 }
  0xf5   :  { %691 = vmatpush3.msra.mxu1 %v166_v49 }
  0xf6   :  { %692 = vmatprep.subr.mxu1 %v165_v51 }
  0xf7   :  { %693 = vmatpush3.msra.mxu1 %v165_v51 }
  0xf8   :  { %694 = vmatprep.subr.mxu1 %v164_v52 }
  0xf9   :  { %695 = vmatpush3.msra.mxu1 %v164_v52 }
  0xfa   :  { %696 = vmatprep.subr.mxu1 %v163_v53 }
  0xfb   :  { %697 = vmatpush3.msra.mxu1 %v163_v53 }
  0xfc   :  { %698 = vmatprep.subr.mxu1 %v162_v54 }
  0xfd   :  { %699 = vmatpush3.msra.mxu1 %v162_v54 }
  0xfe   :  { %700 = vmatprep.subr.mxu1 %v161_v55 }
  0xff   :  { %701 = vmatpush3.msra.mxu1 %v161_v55 }
 0x100   :  { %702 = vmatprep.subr.mxu1 %v160_v56 }
 0x101   :  { %703 = vmatpush3.msra.mxu1 %v160_v56 }
 0x102   :  { %705 = vmatmul.mubr.msk.f32.vlgmr.msra.gmra.mxu1 %vm135_vm1, %v159_v59  ;;  %726 = vmatprep.subr.mxu1 %v451_v57 }
 0x103   :  { %727 = vmatpush3.msra.mxu1 %v451_v57  ;;  %734 = vmatprep.mubr.msk.f32.mxu1 %vm459_vm3, %v446_v58 }
 0x104   :  { %728 = vmatprep.subr.mxu1 %v450_v60 }
 0x105   :  { %729 = vmatpush3.msra.mxu1 %v450_v60 }
 0x106   :  { %730 = vmatprep.subr.mxu1 %v449_v61 }
 0x107   :  { %731 = vmatpush3.msra.mxu1 %v449_v61 }
 0x108   :  { %732 = vmatprep.subr.mxu1 %v448_v62 }
 0x109   :  { %733 = vmatpush3.msra.mxu1 %v448_v62 }
 0x10a   :  { %735 = vmatmul.mubr.msk.f32.vlgmr.msra.gmra.mxu1 %vm459_vm3, %v447_v63 }
 0x1b2   :  { %v687_v0 = vpop.f32.mrf.mxu1 }
 0x1b3   :  { %v725_v2 = vpop.f32.mrf.mxu0 }
 0x1b4   :  { %v251_v1 = vpop.f32.mrf.mxu1 }
 0x1b5   :  { %v424_v8 = vpop.f32.mrf.mxu0 }
 0x1c2   :  { %v706_v3 = vpop.f32.mrf.mxu1 }
 0x1c3   :  { %v338_v4 = vadd.f32 %v706_v3, %v687_v0 }
 0x1c4   :  { %v332_v5 = vpop.f32.mrf.mxu1 }
 0x1c5   :  { %v434_v6 = vadd.f32 %v725_v2, %v338_v4  ;;  %v333_v7 = vadd.f32 %v332_v5, %v251_v1 }
 0x1c7   :  { %v433_v10 = vadd.f32 %v424_v8, %v333_v7  ;;  %v443_v12 = vadd.f32 %v588_v9, %v434_v6 }
 0x1c9   :  { %v442_v14 = vadd.f32 %v588_v9, %v433_v10  ;;  %v445_v17 = vmax.f32 %v443_v12, 0.0 }
 0x1ca   :  { %v736_v13 = vpop.f32.mrf.mxu1 }
 0x1cb   :  { %v538_v15 = vadd.f32 %v736_v13, %v589_v11  ;;  %v444_v21 = vmax.f32 %v442_v14, 0.0 }
 0x1cc   :  { %v532_v16 = vpop.f32.mrf.mxu1 }
 0x1cd   :  { %v542_v18 = vmax.f32 %v538_v15, 0.0  ;;  %v533_v19 = vadd.f32 %v589_v11, %v532_v16 }
 0x1cf   :  { %v544_v20 = vadd.f32 %v542_v18, %v445_v17  ;;  %v541_v22 = vmax.f32 %v533_v19, 0.0 }
 0x1d1   :  { %546 = vst.msk [vmem:[#allocation4 + $0x8] sm:$0xff] %vm135_vm1, %v544_v20  ;;  %v543_v23 = vadd.f32 %v541_v22, %v444_v21 }
 0x1d3   :  { %545 = vst.msk [vmem:[#allocation4] sm:$0xff] %vm135_vm1, %v543_v23 }
 0x1d4   :  { %752 = shalt.err (!%p749_p4)
}
 0x1d5   :  { %s765_s7 = smov 128   ;;  %s766_s24 = smov 8  }
 0x1d6   :  { %558 = dma.vmem_to_hbm [thread:$0]  %s553_s23, 256, %s986_s8, [#allocation5], %s765_s7, %s765_s7, %s766_s24  }
 0x1d7   :  { %761 = dma.done.wait [#allocation5], 256  }
 0x1d8   :  { %762 = vsyncadd [#allocation5], 4294967040 }
 0x1d9   :  { %562 = vsyncpa [#allocation5], 1 }

</bundles_post_ra>
